<compile_context>
chip_gen: v5e
topology: v5e:2x2
jax: 0.10.0
libtpu: 0.0.40
codegen_flags: <defaults>
</compile_context>

<pallas_src>
import functools

import jax
import jax.numpy as jnp
from jax.experimental import pallas as pl
from jax.experimental.pallas import tpu as pltpu

NEG_SLOPE = 0.01  # torch LeakyReLU / F.leaky_relu default


def _leaky_relu(x):
    # maximum(x, 0.01*x) == leaky_relu(x) for 0 < slope < 1; 2 VPU ops not 3.
    return jnp.maximum(x, NEG_SLOPE * x)


def _round_up(n, m):
    return ((n + m - 1) // m) * m


def _default_compute_dtype():
    """bf16 elementwise math on bf16-capable VPUs (v6e/v7x), f32 elsewhere."""
    try:
        kind = jax.devices()[0].device_kind.lower()
    except Exception:  # pragma: no cover - no device info available
        return jnp.float32
    if "v5" in kind or "v4" in kind or "v3" in kind or "v2" in kind:
        return jnp.float32
    return jnp.bfloat16


def _choose_tile(batch, cap):
    """Pick the batch tile.

    Small batches: one tile, rounded to the 8-row sublane granule.
    Large batches: big tiles (amortize per-grid-step overhead) but keep the
    grid at >= 2 steps so both v7x TensorCores get work via the "parallel"
    grid axis.  Capped at `cap` (default 2048) so f32 intermediates stay well
    inside v5e's 16 MiB default scoped VMEM and v7x's 64 MiB physical VMEM.
    """
    cap = max(256, _round_up(cap, 256))
    if batch <= 512:
        return _round_up(max(batch, 8), 8)
    return min(cap, _round_up(pl.cdiv(batch, 2), 256))


# ---------------------------------------------------------------------------
# Kernel
# ---------------------------------------------------------------------------
def mlp_kernel(x_ref,
               wa_ref, ba_ref,      # fused encoder layer 1: (5, 64)
               wb_ref, bb_ref,      # fused encoder layer 2: (64, 128)
               wr1_ref, br1_ref,    # ResBlock128 #1: (128, 128)
               wr2_ref, br2_ref,    # ResBlock128 #2
               wr3_ref, br3_ref,    # ResBlock128 #3
               wp1_ref, bp1_ref,    # post Linear(128, 64)
               wp2_ref, bp2_ref,    # post Linear(64, 2)
               o_ref,
               *, compute_dtype):
    def dense(h, w_ref, b_ref):
        # bf16 operands, f32 accumulation on the MXU; bias add in compute dtype.
        y = jnp.dot(h.astype(jnp.bfloat16), w_ref[...],
                    preferred_element_type=jnp.float32)
        return y.astype(compute_dtype) + b_ref[...]

    x = x_ref[...].astype(compute_dtype)                  # (tm, 5)

    # Fused encoders: columns [0:64] = encoding3to64(origin),
    #                 columns [64:128] = encoding2to64(direction).
    h = _leaky_relu(dense(x, wa_ref, ba_ref))             # (tm, 64)
    out1 = _leaky_relu(dense(h, wb_ref, bb_ref))          # (tm, 128) == concat

    # res_block = 3 x ResBlock128: r = leaky_relu(r + Linear(r))
    r = out1
    r = _leaky_relu(r + dense(r, wr1_ref, br1_ref))
    r = _leaky_relu(r + dense(r, wr2_ref, br2_ref))
    r = _leaky_relu(r + dense(r, wr3_ref, br3_ref))

    # post_block on (out1 + out2)
    s = out1 + r
    p = _leaky_relu(dense(s, wp1_ref, bp1_ref))           # (tm, 64)
    # Final 2-wide layer + sigmoid in f32 for output accuracy.
    y = jnp.dot(p.astype(jnp.bfloat16), wp2_ref[...],
                preferred_element_type=jnp.float32) + bp2_ref[...].astype(jnp.float32)
    o_ref[...] = jax.nn.sigmoid(y).astype(o_ref.dtype)


# ---------------------------------------------------------------------------
# Wrapper
# ---------------------------------------------------------------------------
def neural_vis_forward(x, kernel_params, *, tile_m=2048, compute_dtype=None):
    """x: (batch, 5) float32.  Returns (batch, 2) float32 (sigmoid outputs)."""
    batch, fin = x.shape
    assert fin == 5, "input must be (batch, 5)"
    if compute_dtype is None:
        compute_dtype = _default_compute_dtype()

    tm = _choose_tile(batch, tile_m)
    grid = (pl.cdiv(batch, tm),)   # ragged last tile is fine: no cross-row deps,
                                   # OOB output rows are masked on writeback.

    def weight_spec(arr):
        # Whole (small) array resident in VMEM; constant block index means it is
        # not re-DMA'd as the batch grid advances.
        return pl.BlockSpec(arr.shape, lambda i: (0, 0))

    kernel = functools.partial(mlp_kernel, compute_dtype=compute_dtype)
    out = pl.pallas_call(
        kernel,
        out_shape=jax.ShapeDtypeStruct((batch, 2), jnp.float32),
        grid_spec=pltpu.PrefetchScalarGridSpec(
            num_scalar_prefetch=0,
            grid=grid,
            in_specs=[pl.BlockSpec((tm, 5), lambda i: (i, 0))] +
                     [weight_spec(p) for p in kernel_params],
            out_specs=pl.BlockSpec((tm, 2), lambda i: (i, 0)),
        ),
        compiler_params=pltpu.CompilerParams(
            dimension_semantics=("parallel",),   # megacore sharding on v7x
            vmem_limit_bytes=32 << 20),          # headroom on v5e (16 MiB default)
    )(x, *kernel_params)
    return out


# ---------------------------------------------------------------------------
# Parameters (torch.nn.Linear-style init), fused/packed for the kernel
# ---------------------------------------------------------------------------
def init_params(key):
    """Raw per-layer params matching the torch module.
    Weights stored transposed: (in_features, out_features); biases (1, out)."""
    specs = [("e3a", 3, 32), ("e3b", 32, 64),
             ("e2a", 2, 32), ("e2b", 32, 64),
             ("r1", 128, 128), ("r2", 128, 128), ("r3", 128, 128),
             ("p1", 128, 64), ("p2", 64, 2)]
    raw = {}
    for name, fan_in, fan_out in specs:
        key, kw, kb = jax.random.split(key, 3)
        bound = 1.0 / (fan_in ** 0.5)
        raw[name + "_w"] = jax.random.uniform(kw, (fan_in, fan_out),
                                              jnp.float32, -bound, bound)
        raw[name + "_b"] = jax.random.uniform(kb, (1, fan_out),
                                              jnp.float32, -bound, bound)
    return raw


def prepare_kernel_params(raw, compute_dtype=jnp.bfloat16):
    """Fuse the two encoder branches into block-diagonal weights; weights in
    bf16 (MXU operands), biases in the elementwise compute dtype."""
    # Layer A: (5, 64) -- rows 0:3 / cols 0:32 = enc3 L1, rows 3:5 / cols 32:64 = enc2 L1
    wa = jnp.zeros((5, 64), jnp.float32)
    wa = wa.at[0:3, 0:32].set(raw["e3a_w"]).at[3:5, 32:64].set(raw["e2a_w"])
    ba = jnp.concatenate([raw["e3a_b"], raw["e2a_b"]], axis=1)        # (1, 64)
    # Layer B: (64, 128) -- block-diag of the two 32->64 layers; output = concat order
    wb = jnp.zeros((64, 128), jnp.float32)
    wb = wb.at[0:32, 0:64].set(raw["e3b_w"]).at[32:64, 64:128].set(raw["e2b_w"])
    bb = jnp.concatenate([raw["e3b_b"], raw["e2b_b"]], axis=1)        # (1, 128)

    ws = [wa, wb, raw["r1_w"], raw["r2_w"], raw["r3_w"], raw["p1_w"], raw["p2_w"]]
    bs = [ba, bb, raw["r1_b"], raw["r2_b"], raw["r3_b"], raw["p1_b"], raw["p2_b"]]
    out = []
    for w, b in zip(ws, bs):
        out += [w.astype(jnp.bfloat16), b.astype(compute_dtype)]
    return tuple(out)


# ---------------------------------------------------------------------------
# References
# ---------------------------------------------------------------------------
def reference_forward_matched(x, kernel_params, compute_dtype):
    """Mirrors the kernel math exactly (bf16 matmul operands, f32 accumulation,
    compute_dtype elementwise, f32 final layer + sigmoid)."""
    (wa, ba, wb, bb, wr1, br1, wr2, br2, wr3, br3, wp1, bp1, wp2, bp2) = kernel_params

    def dense(h, w, b):
        y = jnp.dot(h.astype(jnp.bfloat16), w, preferred_element_type=jnp.float32)
        return y.astype(compute_dtype) + b

    h = _leaky_relu(dense(x.astype(compute_dtype), wa, ba))
    out1 = _leaky_relu(dense(h, wb, bb))
    r = out1
    for w, b in ((wr1, br1), (wr2, br2), (wr3, br3)):
        r = _leaky_relu(r + dense(r, w, b))
    p = _leaky_relu(dense(out1 + r, wp1, bp1))
    y = jnp.dot(p.astype(jnp.bfloat16), wp2,
                preferred_element_type=jnp.float32) + bp2.astype(jnp.float32)
    return jax.nn.sigmoid(y)


def reference_forward_f32(x, raw):
    """Torch-style f32 reference (unfused encoders, explicit concat)."""
    def lin(h, w, b):
        return h @ w + b

    origin, direction = x[:, 0:3], x[:, 3:5]
    o1 = _leaky_relu(lin(_leaky_relu(lin(origin, raw["e3a_w"], raw["e3a_b"])),
                         raw["e3b_w"], raw["e3b_b"]))
    o2 = _leaky_relu(lin(_leaky_relu(lin(direction, raw["e2a_w"], raw["e2a_b"])),
                         raw["e2b_w"], raw["e2b_b"]))
    out1 = jnp.concatenate([o1, o2], axis=1)
    r = out1
    for n in ("r1", "r2", "r3"):
        r = _leaky_relu(r + lin(r, raw[n + "_w"], raw[n + "_b"]))
    p = _leaky_relu(lin(out1 + r, raw["p1_w"], raw["p1_b"]))
    return jax.nn.sigmoid(lin(p, raw["p2_w"], raw["p2_b"]))


# ---------------------------------------------------------------------------
if __name__ == "__main__":
    key = jax.random.PRNGKey(0)
    key, kx = jax.random.split(key)

    batch = 16  # small demo batch; tile adapts (tm=16, grid=1)
    x = jax.random.normal(kx, (batch, 5), jnp.float32)

    compute_dtype = _default_compute_dtype()
    raw_params = init_params(key)
    kernel_params = prepare_kernel_params(raw_params, compute_dtype)

    out = neural_vis_forward(x, kernel_params, compute_dtype=compute_dtype)
    out = jax.block_until_ready(out)

    assert out.shape == (batch, 2)
    assert bool(jnp.all(jnp.isfinite(out)))

    ref_match = reference_forward_matched(x, kernel_params, compute_dtype)
    ref_f32 = reference_forward_f32(x, raw_params)

    assert jnp.allclose(out, ref_match, atol=5e-3, rtol=0.0), \
        "mismatch vs precision-matched reference"
    assert float(jnp.max(jnp.abs(out - ref_f32))) < 5e-2, \
        "mismatch vs f32 torch-style reference"

    print("KERNEL_OK")
</pallas_src>

<mosaic_0001>
module attributes {stable_mosaic.version = 11 : i64} {
  func.func @mlp_kernel(%arg0: i32, %arg1: memref<16x5xf32, #tpu.memory_space<vmem>>, %arg2: memref<5x64xbf16, #tpu.memory_space<vmem>>, %arg3: memref<1x64xbf16, #tpu.memory_space<vmem>>, %arg4: memref<64x128xbf16, #tpu.memory_space<vmem>>, %arg5: memref<1x128xbf16, #tpu.memory_space<vmem>>, %arg6: memref<128x128xbf16, #tpu.memory_space<vmem>>, %arg7: memref<1x128xbf16, #tpu.memory_space<vmem>>, %arg8: memref<128x128xbf16, #tpu.memory_space<vmem>>, %arg9: memref<1x128xbf16, #tpu.memory_space<vmem>>, %arg10: memref<128x128xbf16, #tpu.memory_space<vmem>>, %arg11: memref<1x128xbf16, #tpu.memory_space<vmem>>, %arg12: memref<128x64xbf16, #tpu.memory_space<vmem>>, %arg13: memref<1x64xbf16, #tpu.memory_space<vmem>>, %arg14: memref<64x2xbf16, #tpu.memory_space<vmem>>, %arg15: memref<1x2xbf16, #tpu.memory_space<vmem>>, %arg16: memref<16x2xf32, #tpu.memory_space<vmem>>) attributes {dimension_semantics = [#tpu.dimension_semantics<parallel>], iteration_bounds = array<i64: 1>, scalar_prefetch = 0 : i64, scratch_operands = 0 : i64, tpu.core_type = #tpu.core_type<tc>, window_params = [{transform_indices = @transform_0, window_bounds = array<i64: 16, 5>}, {pipeline_mode = #tpu.pipeline_mode<synchronous>, transform_indices = @transform_1, window_bounds = array<i64: 5, 64>}, {pipeline_mode = #tpu.pipeline_mode<synchronous>, transform_indices = @transform_2, window_bounds = array<i64: 1, 64>}, {pipeline_mode = #tpu.pipeline_mode<synchronous>, transform_indices = @transform_3, window_bounds = array<i64: 64, 128>}, {pipeline_mode = #tpu.pipeline_mode<synchronous>, transform_indices = @transform_4, window_bounds = array<i64: 1, 128>}, {pipeline_mode = #tpu.pipeline_mode<synchronous>, transform_indices = @transform_5, window_bounds = array<i64: 128, 128>}, {pipeline_mode = #tpu.pipeline_mode<synchronous>, transform_indices = @transform_6, window_bounds = array<i64: 1, 128>}, {pipeline_mode = #tpu.pipeline_mode<synchronous>, transform_indices = @transform_7, window_bounds = array<i64: 128, 128>}, {pipeline_mode = #tpu.pipeline_mode<synchronous>, transform_indices = @transform_8, window_bounds = array<i64: 1, 128>}, {pipeline_mode = #tpu.pipeline_mode<synchronous>, transform_indices = @transform_9, window_bounds = array<i64: 128, 128>}, {pipeline_mode = #tpu.pipeline_mode<synchronous>, transform_indices = @transform_10, window_bounds = array<i64: 1, 128>}, {pipeline_mode = #tpu.pipeline_mode<synchronous>, transform_indices = @transform_11, window_bounds = array<i64: 128, 64>}, {pipeline_mode = #tpu.pipeline_mode<synchronous>, transform_indices = @transform_12, window_bounds = array<i64: 1, 64>}, {pipeline_mode = #tpu.pipeline_mode<synchronous>, transform_indices = @transform_13, window_bounds = array<i64: 64, 2>}, {pipeline_mode = #tpu.pipeline_mode<synchronous>, transform_indices = @transform_14, window_bounds = array<i64: 1, 2>}, {transform_indices = @transform_15, window_bounds = array<i64: 16, 2>}]} {
    %c0 = arith.constant 0 : index
    %c0_0 = arith.constant 0 : index
    %0 = vector.load %arg1[%c0, %c0_0] : memref<16x5xf32, #tpu.memory_space<vmem>>, vector<16x5xf32>
    %1 = arith.truncf %0 : vector<16x5xf32> to vector<16x5xbf16>
    %c0_1 = arith.constant 0 : index
    %c0_2 = arith.constant 0 : index
    %2 = vector.load %arg2[%c0_1, %c0_2] : memref<5x64xbf16, #tpu.memory_space<vmem>>, vector<5x64xbf16>
    %cst = arith.constant dense<0.000000e+00> : vector<16x64xf32>
    %3 = tpu.matmul %1, %2, %cst {dimension_numbers = #tpu.dot_dimension_numbers<[1], [0], [0], [1], [0, 0, 1, 1], [], []>} : vector<16x5xbf16>, vector<5x64xbf16>, vector<16x64xf32> -> vector<16x64xf32>
    %4 = arith.truncf %3 : vector<16x64xf32> to vector<16x64xbf16>
    %c0_3 = arith.constant 0 : index
    %c0_4 = arith.constant 0 : index
    %5 = vector.load %arg3[%c0_3, %c0_4] : memref<1x64xbf16, #tpu.memory_space<vmem>>, vector<1x64xbf16>
    %6 = vector.broadcast %5 : vector<1x64xbf16> to vector<16x64xbf16>
    %7 = arith.addf %4, %6 : vector<16x64xbf16>
    %cst_5 = arith.constant 1.000980e-02 : bf16
    %8 = vector.broadcast %cst_5 : bf16 to vector<16x64xbf16>
    %9 = arith.mulf %8, %7 : vector<16x64xbf16>
    %10 = arith.maximumf %7, %9 : vector<16x64xbf16>
    %c0_6 = arith.constant 0 : index
    %c0_7 = arith.constant 0 : index
    %11 = vector.load %arg4[%c0_6, %c0_7] : memref<64x128xbf16, #tpu.memory_space<vmem>>, vector<64x128xbf16>
    %cst_8 = arith.constant dense<0.000000e+00> : vector<16x128xf32>
    %12 = tpu.matmul %10, %11, %cst_8 {dimension_numbers = #tpu.dot_dimension_numbers<[1], [0], [0], [1], [0, 0, 1, 1], [], []>} : vector<16x64xbf16>, vector<64x128xbf16>, vector<16x128xf32> -> vector<16x128xf32>
    %13 = arith.truncf %12 : vector<16x128xf32> to vector<16x128xbf16>
    %c0_9 = arith.constant 0 : index
    %c0_10 = arith.constant 0 : index
    %14 = vector.load %arg5[%c0_9, %c0_10] : memref<1x128xbf16, #tpu.memory_space<vmem>>, vector<1x128xbf16>
    %15 = vector.broadcast %14 : vector<1x128xbf16> to vector<16x128xbf16>
    %16 = arith.addf %13, %15 : vector<16x128xbf16>
    %cst_11 = arith.constant 1.000980e-02 : bf16
    %17 = vector.broadcast %cst_11 : bf16 to vector<16x128xbf16>
    %18 = arith.mulf %17, %16 : vector<16x128xbf16>
    %19 = arith.maximumf %16, %18 : vector<16x128xbf16>
    %c0_12 = arith.constant 0 : index
    %c0_13 = arith.constant 0 : index
    %20 = vector.load %arg6[%c0_12, %c0_13] : memref<128x128xbf16, #tpu.memory_space<vmem>>, vector<128x128xbf16>
    %cst_14 = arith.constant dense<0.000000e+00> : vector<16x128xf32>
    %21 = tpu.matmul %19, %20, %cst_14 {dimension_numbers = #tpu.dot_dimension_numbers<[1], [0], [0], [1], [0, 0, 1, 1], [], []>} : vector<16x128xbf16>, vector<128x128xbf16>, vector<16x128xf32> -> vector<16x128xf32>
    %22 = arith.truncf %21 : vector<16x128xf32> to vector<16x128xbf16>
    %c0_15 = arith.constant 0 : index
    %c0_16 = arith.constant 0 : index
    %23 = vector.load %arg7[%c0_15, %c0_16] : memref<1x128xbf16, #tpu.memory_space<vmem>>, vector<1x128xbf16>
    %24 = vector.broadcast %23 : vector<1x128xbf16> to vector<16x128xbf16>
    %25 = arith.addf %22, %24 : vector<16x128xbf16>
    %26 = arith.addf %19, %25 : vector<16x128xbf16>
    %cst_17 = arith.constant 1.000980e-02 : bf16
    %27 = vector.broadcast %cst_17 : bf16 to vector<16x128xbf16>
    %28 = arith.mulf %27, %26 : vector<16x128xbf16>
    %29 = arith.maximumf %26, %28 : vector<16x128xbf16>
    %c0_18 = arith.constant 0 : index
    %c0_19 = arith.constant 0 : index
    %30 = vector.load %arg8[%c0_18, %c0_19] : memref<128x128xbf16, #tpu.memory_space<vmem>>, vector<128x128xbf16>
    %cst_20 = arith.constant dense<0.000000e+00> : vector<16x128xf32>
    %31 = tpu.matmul %29, %30, %cst_20 {dimension_numbers = #tpu.dot_dimension_numbers<[1], [0], [0], [1], [0, 0, 1, 1], [], []>} : vector<16x128xbf16>, vector<128x128xbf16>, vector<16x128xf32> -> vector<16x128xf32>
    %32 = arith.truncf %31 : vector<16x128xf32> to vector<16x128xbf16>
    %c0_21 = arith.constant 0 : index
    %c0_22 = arith.constant 0 : index
    %33 = vector.load %arg9[%c0_21, %c0_22] : memref<1x128xbf16, #tpu.memory_space<vmem>>, vector<1x128xbf16>
    %34 = vector.broadcast %33 : vector<1x128xbf16> to vector<16x128xbf16>
    %35 = arith.addf %32, %34 : vector<16x128xbf16>
    %36 = arith.addf %29, %35 : vector<16x128xbf16>
    %cst_23 = arith.constant 1.000980e-02 : bf16
    %37 = vector.broadcast %cst_23 : bf16 to vector<16x128xbf16>
    %38 = arith.mulf %37, %36 : vector<16x128xbf16>
    %39 = arith.maximumf %36, %38 : vector<16x128xbf16>
    %c0_24 = arith.constant 0 : index
    %c0_25 = arith.constant 0 : index
    %40 = vector.load %arg10[%c0_24, %c0_25] : memref<128x128xbf16, #tpu.memory_space<vmem>>, vector<128x128xbf16>
    %cst_26 = arith.constant dense<0.000000e+00> : vector<16x128xf32>
    %41 = tpu.matmul %39, %40, %cst_26 {dimension_numbers = #tpu.dot_dimension_numbers<[1], [0], [0], [1], [0, 0, 1, 1], [], []>} : vector<16x128xbf16>, vector<128x128xbf16>, vector<16x128xf32> -> vector<16x128xf32>
    %42 = arith.truncf %41 : vector<16x128xf32> to vector<16x128xbf16>
    %c0_27 = arith.constant 0 : index
    %c0_28 = arith.constant 0 : index
    %43 = vector.load %arg11[%c0_27, %c0_28] : memref<1x128xbf16, #tpu.memory_space<vmem>>, vector<1x128xbf16>
    %44 = vector.broadcast %43 : vector<1x128xbf16> to vector<16x128xbf16>
    %45 = arith.addf %42, %44 : vector<16x128xbf16>
    %46 = arith.addf %39, %45 : vector<16x128xbf16>
    %cst_29 = arith.constant 1.000980e-02 : bf16
    %47 = vector.broadcast %cst_29 : bf16 to vector<16x128xbf16>
    %48 = arith.mulf %47, %46 : vector<16x128xbf16>
    %49 = arith.maximumf %46, %48 : vector<16x128xbf16>
    %50 = arith.addf %19, %49 : vector<16x128xbf16>
    %c0_30 = arith.constant 0 : index
    %c0_31 = arith.constant 0 : index
    %51 = vector.load %arg12[%c0_30, %c0_31] : memref<128x64xbf16, #tpu.memory_space<vmem>>, vector<128x64xbf16>
    %cst_32 = arith.constant dense<0.000000e+00> : vector<16x64xf32>
    %52 = tpu.matmul %50, %51, %cst_32 {dimension_numbers = #tpu.dot_dimension_numbers<[1], [0], [0], [1], [0, 0, 1, 1], [], []>} : vector<16x128xbf16>, vector<128x64xbf16>, vector<16x64xf32> -> vector<16x64xf32>
    %53 = arith.truncf %52 : vector<16x64xf32> to vector<16x64xbf16>
    %c0_33 = arith.constant 0 : index
    %c0_34 = arith.constant 0 : index
    %54 = vector.load %arg13[%c0_33, %c0_34] : memref<1x64xbf16, #tpu.memory_space<vmem>>, vector<1x64xbf16>
    %55 = vector.broadcast %54 : vector<1x64xbf16> to vector<16x64xbf16>
    %56 = arith.addf %53, %55 : vector<16x64xbf16>
    %cst_35 = arith.constant 1.000980e-02 : bf16
    %57 = vector.broadcast %cst_35 : bf16 to vector<16x64xbf16>
    %58 = arith.mulf %57, %56 : vector<16x64xbf16>
    %59 = arith.maximumf %56, %58 : vector<16x64xbf16>
    %c0_36 = arith.constant 0 : index
    %c0_37 = arith.constant 0 : index
    %60 = vector.load %arg14[%c0_36, %c0_37] : memref<64x2xbf16, #tpu.memory_space<vmem>>, vector<64x2xbf16>
    %cst_38 = arith.constant dense<0.000000e+00> : vector<16x2xf32>
    %61 = tpu.matmul %59, %60, %cst_38 {dimension_numbers = #tpu.dot_dimension_numbers<[1], [0], [0], [1], [0, 0, 1, 1], [], []>} : vector<16x64xbf16>, vector<64x2xbf16>, vector<16x2xf32> -> vector<16x2xf32>
    %c0_39 = arith.constant 0 : index
    %c0_40 = arith.constant 0 : index
    %62 = vector.load %arg15[%c0_39, %c0_40] : memref<1x2xbf16, #tpu.memory_space<vmem>>, vector<1x2xbf16>
    %63 = arith.extf %62 : vector<1x2xbf16> to vector<1x2xf32>
    %64 = vector.broadcast %63 : vector<1x2xf32> to vector<16x2xf32>
    %65 = arith.addf %61, %64 : vector<16x2xf32>
    %66 = arith.negf %65 : vector<16x2xf32>
    %67 = math.exp %66 : vector<16x2xf32>
    %cst_41 = arith.constant 1.000000e+00 : f32
    %68 = vector.broadcast %cst_41 : f32 to vector<16x2xf32>
    %69 = arith.addf %68, %67 : vector<16x2xf32>
    %70 = arith.divf %68, %69 : vector<16x2xf32>
    %c0_42 = arith.constant 0 : index
    %c0_43 = arith.constant 0 : index
    %71 = vector.load %arg16[%c0_42, %c0_43] : memref<16x2xf32, #tpu.memory_space<vmem>>, vector<16x2xf32>
    tpu.vector_store %arg16[%c0_42, %c0_43], %70 {strides = array<i32>} : memref<16x2xf32, #tpu.memory_space<vmem>>, vector<16x2xf32>,
    return
  }
  func.func @transform_0(%arg0: i32) -> (i32, i32) {
    %c0_i32 = arith.constant 0 : i32
    %c0_i32_0 = arith.constant 0 : i32
    return %arg0, %c0_i32 : i32, i32
  }
  func.func @transform_1(%arg0: i32) -> (i32, i32) {
    %c0_i32 = arith.constant 0 : i32
    %c0_i32_0 = arith.constant 0 : i32
    %c0_i32_1 = arith.constant 0 : i32
    return %c0_i32, %c0_i32_0 : i32, i32
  }
  func.func @transform_2(%arg0: i32) -> (i32, i32) {
    %c0_i32 = arith.constant 0 : i32
    %c0_i32_0 = arith.constant 0 : i32
    %c0_i32_1 = arith.constant 0 : i32
    return %c0_i32, %c0_i32_0 : i32, i32
  }
  func.func @transform_3(%arg0: i32) -> (i32, i32) {
    %c0_i32 = arith.constant 0 : i32
    %c0_i32_0 = arith.constant 0 : i32
    %c0_i32_1 = arith.constant 0 : i32
    return %c0_i32, %c0_i32_0 : i32, i32
  }
  func.func @transform_4(%arg0: i32) -> (i32, i32) {
    %c0_i32 = arith.constant 0 : i32
    %c0_i32_0 = arith.constant 0 : i32
    %c0_i32_1 = arith.constant 0 : i32
    return %c0_i32, %c0_i32_0 : i32, i32
  }
  func.func @transform_5(%arg0: i32) -> (i32, i32) {
    %c0_i32 = arith.constant 0 : i32
    %c0_i32_0 = arith.constant 0 : i32
    %c0_i32_1 = arith.constant 0 : i32
    return %c0_i32, %c0_i32_0 : i32, i32
  }
  func.func @transform_6(%arg0: i32) -> (i32, i32) {
    %c0_i32 = arith.constant 0 : i32
    %c0_i32_0 = arith.constant 0 : i32
    %c0_i32_1 = arith.constant 0 : i32
    return %c0_i32, %c0_i32_0 : i32, i32
  }
  func.func @transform_7(%arg0: i32) -> (i32, i32) {
    %c0_i32 = arith.constant 0 : i32
    %c0_i32_0 = arith.constant 0 : i32
    %c0_i32_1 = arith.constant 0 : i32
    return %c0_i32, %c0_i32_0 : i32, i32
  }
  func.func @transform_8(%arg0: i32) -> (i32, i32) {
    %c0_i32 = arith.constant 0 : i32
    %c0_i32_0 = arith.constant 0 : i32
    %c0_i32_1 = arith.constant 0 : i32
    return %c0_i32, %c0_i32_0 : i32, i32
  }
  func.func @transform_9(%arg0: i32) -> (i32, i32) {
    %c0_i32 = arith.constant 0 : i32
    %c0_i32_0 = arith.constant 0 : i32
    %c0_i32_1 = arith.constant 0 : i32
    return %c0_i32, %c0_i32_0 : i32, i32
  }
  func.func @transform_10(%arg0: i32) -> (i32, i32) {
    %c0_i32 = arith.constant 0 : i32
    %c0_i32_0 = arith.constant 0 : i32
    %c0_i32_1 = arith.constant 0 : i32
    return %c0_i32, %c0_i32_0 : i32, i32
  }
  func.func @transform_11(%arg0: i32) -> (i32, i32) {
    %c0_i32 = arith.constant 0 : i32
    %c0_i32_0 = arith.constant 0 : i32
    %c0_i32_1 = arith.constant 0 : i32
    return %c0_i32, %c0_i32_0 : i32, i32
  }
  func.func @transform_12(%arg0: i32) -> (i32, i32) {
    %c0_i32 = arith.constant 0 : i32
    %c0_i32_0 = arith.constant 0 : i32
    %c0_i32_1 = arith.constant 0 : i32
    return %c0_i32, %c0_i32_0 : i32, i32
  }
  func.func @transform_13(%arg0: i32) -> (i32, i32) {
    %c0_i32 = arith.constant 0 : i32
    %c0_i32_0 = arith.constant 0 : i32
    %c0_i32_1 = arith.constant 0 : i32
    return %c0_i32, %c0_i32_0 : i32, i32
  }
  func.func @transform_14(%arg0: i32) -> (i32, i32) {
    %c0_i32 = arith.constant 0 : i32
    %c0_i32_0 = arith.constant 0 : i32
    %c0_i32_1 = arith.constant 0 : i32
    return %c0_i32, %c0_i32_0 : i32, i32
  }
  func.func @transform_15(%arg0: i32) -> (i32, i32) {
    %c0_i32 = arith.constant 0 : i32
    %c0_i32_0 = arith.constant 0 : i32
    return %arg0, %c0_i32 : i32, i32
  }
}

</mosaic_0001>

<bundles_post_ra>
// kernel: tpu_custom_call.1
= control target key start
LH: loop header
LB: loop body
LE: loop exit
PB: predicated region body
PF: predicated region fallthrough
CT: control target
= control target key end

     0   :  { %20 = vsyncpa [#allocation3], 0  ;;  %s1263_s0 = inlined_call_operand.vmem [shape: f32[16,5], index: 0, kind: input, shape index: {}]   ;;  %s1264_s1 = inlined_call_operand.vmem [shape: bf16[5,64], index: 1, kind: input, shape index: {}]   ;;  %s1265_s2 = inlined_call_operand.vmem [shape: bf16[1,64], index: 2, kind: input, shape index: {}]   ;;  %s1266_s3 = inlined_call_operand.vmem [shape: bf16[64,128], index: 3, kind: input, shape index: {}]   ;;  %s1267_s4 = inlined_call_operand.vmem [shape: bf16[1,128], index: 4, kind: input, shape index: {}]   ;;  %s1268_s5 = inlined_call_operand.vmem [shape: bf16[128,128], index: 5, kind: input, shape index: {}]   ;;  %s1269_s6 = inlined_call_operand.vmem [shape: bf16[1,128], index: 6, kind: input, shape index: {}]   ;;  %s1270_s7 = inlined_call_operand.hbm [shape: bf16[128,128], index: 7, kind: input, shape index: {}]   ;;  %s1271_s8 = inlined_call_operand.vmem [shape: bf16[1,128], index: 8, kind: input, shape index: {}]   ;;  %s1272_s9 = inlined_call_operand.hbm [shape: bf16[128,128], index: 9, kind: input, shape index: {}]   ;;  %s1273_s10 = inlined_call_operand.vmem [shape: bf16[1,128], index: 10, kind: input, shape index: {}]   ;;  %s1274_s11 = inlined_call_operand.vmem [shape: bf16[128,64], index: 11, kind: input, shape index: {}]   ;;  %s1275_s12 = inlined_call_operand.vmem [shape: bf16[1,64], index: 12, kind: input, shape index: {}]   ;;  %s1276_s13 = inlined_call_operand.vmem [shape: bf16[64,2], index: 13, kind: input, shape index: {}]   ;;  %s1277_s14 = inlined_call_operand.vmem [shape: bf16[1,2], index: 14, kind: input, shape index: {}]   ;;  %s1278_s15 = inlined_call_operand.vmem [shape: f32[16,2], index: 15, kind: output, shape index: {}]  }
   0x1   :  { %s40_s20 = sshll.u32 %s1270_s7, 4  ;;  %s41_s20 = int_to_ptr.hbm [resolvable:$true] %s40_s20 }
   0x2   :  { %21 = vsyncpa [#allocation5], 0  ;;  %s1044_s21 = smov [#allocation2]   ;;  %s55_s25 = sshll.u32 %s1272_s9, 4  ;;  %s56_s25 = int_to_ptr.hbm [resolvable:$true] %s55_s25 }
   0x3   :  { %s42_s22 = sshll.u32 %s1044_s21, 4  ;;  %s1045_s26 = smov 64   ;;  %s43_s22 = int_to_ptr.vmem [resolvable:$true] %s42_s22 }
   0x4   :  { %s1046_s27 = smov 4   ;;  %s1047_s28 = smov [#allocation4]  }
   0x5   :  { %48 = dma.hbm_to_vmem [thread:$0]  %s41_s20, 1024, %s43_s22, [#allocation3], %s1045_s26, %s1045_s26, %s1046_s27  }
   0x6   :  { %s57_s29 = sshll.u32 %s1047_s28, 4  ;;  %s58_s29 = int_to_ptr.vmem [resolvable:$true] %s57_s29 }
   0x7   :  { %63 = dma.hbm_to_vmem [thread:$0]  %s56_s25, 1024, %s58_s29, [#allocation5], %s1045_s26, %s1045_s26, %s1046_s27  }
   0x8   :  { %1040 = dma.done.wait [#allocation3], 1024  }
   0x9   :  { %1041 = vsyncadd [#allocation3], 4294966272 }
   0xa   :  { %1042 = dma.done.wait [#allocation5], 1024  }
   0xb   :  { %1043 = vsyncadd [#allocation5], 4294966272  ;;  %vm91_vm0 = vcmask 1041408   ;;  %vm92_vm1 = vcmask 1042432   ;;  %v1048_v0 = vmov 65535   ;;  %v83_v4 = vld [vmem:[%s1263_s0] sm:$0xff] }
   0xc   :  { %v93_v1 = vsel %vm91_vm0, 4294967295, %v1048_v0  ;;  %v86_v3 = vld [vmem:[%s1264_s1] sm:$0x7]  ;;  %v84_v5 = vld [vmem:[%s1263_s0 + $0x8] sm:$0xff]  ;;  %vm87_vm2 = vcmask 39936   ;;  %v942_v8 = vld [vmem:[%s1266_s3 + $0x18] sm:$0xff] }
   0xd   :  { %v94_v2 = vsel %vm92_vm1, %v93_v1, 0  ;;  %v85_v7 = vpack.c.bf16 %v84_v5, %v83_v4  ;;  %177 = vmatpush.bf16.msra.mxu1 %v942_v8  ;;  %v941_v9 = vld [vmem:[%s1266_s3 + $0x10] sm:$0xff]  ;;  %v940_v10 = vld [vmem:[%s1266_s3 + $0x8] sm:$0xff]  ;;  %v939_v11 = vld [vmem:[%s1266_s3] sm:$0xff]  ;;  %vm169_vm3 = vcmask 523264   ;;  %vm765_vm7 = vcmask 15360  }
   0xe   :  { %v96_v6 = vand.u32 %v94_v2, %v86_v3  ;;  %v114_v12 = vld [vmem:[%s1265_s2] sm:$0x1]  ;;  %v950_v14 = vld [vmem:[%s1268_s5 + $0x38] sm:$0xff]  ;;  %v949_v34 = vld [vmem:[%s1268_s5 + $0x30] sm:$0xff] }
   0xf   :  { %v116_v13 = vpack.i.b16 %v114_v12, %v114_v12  ;;  %283 = vmatpush.bf16.msra.mxu2 %v950_v14  ;;  %v948_v35 = vld [vmem:[%s1268_s5 + $0x28] sm:$0xff]  ;;  %v947_v36 = vld [vmem:[%s1268_s5 + $0x20] sm:$0xff]  ;;  %v946_v37 = vld [vmem:[%s1268_s5 + $0x18] sm:$0xff] }
  0x10   :  { %105 = vmatpush.bf16.msra.mxu0 %v96_v6  ;;  %v945_v38 = vld [vmem:[%s1268_s5 + $0x10] sm:$0xff]  ;;  %v944_v39 = vld [vmem:[%s1268_s5 + $0x8] sm:$0xff]  ;;  %v189_v40 = vld [vmem:[%s1267_s4] sm:$0x1] }
  0x11   :  { %178 = vmatpush.bf16.msra.mxu1 %v941_v9  ;;  %v118_v15 = vperm.slane %v116_v13, 0  ;;  %v943_v41 = vld [vmem:[%s1268_s5] sm:$0xff]  ;;  %v191_v42 = vpack.i.b16 %v189_v40, %v189_v40  ;;  %v958_v2 = vld [vmem:[#allocation2 + $0x38] sm:$0xff]  ;;  %v957_v3 = vld [vmem:[#allocation2 + $0x30] sm:$0xff] }
  0x12   :  { %401 = vmatpush.bf16.msra.mxu3 %v958_v2  ;;  %v956_v4 = vld [vmem:[#allocation2 + $0x28] sm:$0xff]  ;;  %v955_v5 = vld [vmem:[#allocation2 + $0x20] sm:$0xff]  ;;  %v954_v6 = vld [vmem:[#allocation2 + $0x18] sm:$0xff] }
  0x13   :  { %774 = vmatmul.msk.bf16.vlgmr.msra.gmra.mxu0 %vm87_vm2, %v85_v7  ;;  %v121_v18 = vunpack.c.l.bf16 %v118_v15  ;;  %284 = vmatpush.bf16.msra.mxu2 %v949_v34  ;;  %v193_v43 = vperm.slane %v191_v42, 0  ;;  %v299_v7 = vld [vmem:[%s1269_s6] sm:$0x1]  ;;  %v953_v8 = vld [vmem:[#allocation2 + $0x10] sm:$0xff]  ;;  %v952_v9 = vld [vmem:[#allocation2 + $0x8] sm:$0xff] }
  0x15   :  { %179 = vmatpush.bf16.msra.mxu1 %v940_v10  ;;  %v196_v46 = vunpack.c.l.bf16 %v193_v43  ;;  %v301_v10 = vpack.i.b16 %v299_v7, %v299_v7  ;;  %v966_v43 = vld [vmem:[#allocation4 + $0x38] sm:$0xff] }
  0x16   :  { %402 = vmatpush.bf16.msra.mxu3 %v957_v3  ;;  %519 = vmatpush.bf16.msrb.mxu0 %v966_v43 }
  0x17   :  { %285 = vmatpush.bf16.msra.mxu2 %v948_v35  ;;  %v303_v12 = vperm.slane %v301_v10, 0 }
  0x19   :  { %180 = vmatpush.bf16.msra.mxu1 %v939_v11  ;;  %v951_v11 = vld [vmem:[#allocation2] sm:$0xff]  ;;  %v306_v15 = vunpack.c.l.bf16 %v303_v12 }
  0x1a   :  { %403 = vmatpush.bf16.msra.mxu3 %v956_v4 }
  0x1b   :  { %286 = vmatpush.bf16.msra.mxu2 %v947_v36 }
  0x1e   :  { %404 = vmatpush.bf16.msra.mxu3 %v955_v5 }
  0x1f   :  { %287 = vmatpush.bf16.msra.mxu2 %v946_v37 }
  0x22   :  { %405 = vmatpush.bf16.msra.mxu3 %v954_v6 }
  0x23   :  { %288 = vmatpush.bf16.msra.mxu2 %v945_v38 }
  0x26   :  { %406 = vmatpush.bf16.msra.mxu3 %v953_v8 }
  0x27   :  { %289 = vmatpush.bf16.msra.mxu2 %v944_v39 }
  0x2a   :  { %407 = vmatpush.bf16.msra.mxu3 %v952_v9 }
  0x2b   :  { %290 = vmatpush.bf16.msra.mxu2 %v943_v41 }
  0x2e   :  { %408 = vmatpush.bf16.msra.mxu3 %v951_v11 }
  0x90   :  { %v107_v16 = vpop.f32.mrf.mxu0 }
  0x91   :  { %v112_v17 = vpack.c.bf16 %v107_v16, %v107_v16 }
  0x93   :  { %v119_v19 = vunpack.c.l.bf16 %v112_v17 }
  0x95   :  { %v122_v20 = vadd.f32 %v121_v18, %v119_v19 }
  0x97   :  { %v124_v22 = vpack.c.bf16 %v122_v20, %v122_v20 }
  0x98   :  { %v109_v21 = vpop.f32.mrf.mxu0 }
  0x99   :  { %v113_v23 = vpack.c.bf16 %v109_v21, %v109_v21  ;;  %v126_v25 = vunpack.c.l.bf16 %v124_v22 }
  0x9b   :  { %v120_v24 = vunpack.c.l.bf16 %v113_v23  ;;  %v128_v28 = vmul.f32 0.010009766, %v126_v25 }
  0x9d   :  { %v123_v26 = vadd.f32 %v121_v18, %v120_v24  ;;  %v134_v31 = vmax.f32 %v126_v25, %v128_v28 }
  0x9f   :  { %v125_v27 = vpack.c.bf16 %v123_v26, %v123_v26 }
  0xa1   :  { %v127_v29 = vunpack.c.l.bf16 %v125_v27 }
  0xa3   :  { %v129_v30 = vmul.f32 0.010009766, %v127_v29 }
  0xa5   :  { %v135_v32 = vmax.f32 %v127_v29, %v129_v30 }
  0xa7   :  { %v136_v33 = vpack.c.bf16 %v135_v32, %v134_v31 }
  0xa9   :  { %791 = vmatmul.msk.bf16.vlgmr.msra.gmra.mxu1 %vm169_vm3, %v136_v33 }
 0x126   :  { %v182_v44 = vpop.f32.mrf.mxu1 }
 0x127   :  { %v187_v45 = vpack.c.bf16 %v182_v44, %v182_v44  ;;  %v965_v44 = vld [vmem:[#allocation4 + $0x30] sm:$0xff] }
 0x128   :  { %520 = vmatpush.bf16.msrb.mxu0 %v965_v44 }
 0x129   :  { %v194_v47 = vunpack.c.l.bf16 %v187_v45  ;;  %v964_v45 = vld [vmem:[#allocation4 + $0x28] sm:$0xff] }
 0x12b   :  { %v197_v48 = vadd.f32 %v196_v46, %v194_v47  ;;  %v962_v47 = vld [vmem:[#allocation4 + $0x18] sm:$0xff] }
 0x12c   :  { %521 = vmatpush.bf16.msrb.mxu0 %v964_v45 }
 0x12d   :  { %v199_v49 = vpack.c.bf16 %v197_v48, %v197_v48  ;;  %v417_v48 = vld [vmem:[%s1271_s8] sm:$0x1] }
 0x12e   :  { %v184_v50 = vpop.f32.mrf.mxu1 }
 0x12f   :  { %v201_v51 = vunpack.c.l.bf16 %v199_v49  ;;  %v188_v52 = vpack.c.bf16 %v184_v50, %v184_v50  ;;  %v961_v49 = vld [vmem:[#allocation4 + $0x10] sm:$0xff]  ;;  %v419_v50 = vpack.i.b16 %v417_v48, %v417_v48 }
 0x131   :  { %v195_v53 = vunpack.c.l.bf16 %v188_v52  ;;  %v203_v54 = vmul.f32 0.010009766, %v201_v51  ;;  %v959_v52 = vld [vmem:[#allocation4] sm:$0xff] }
 0x133   :  { %v198_v55 = vadd.f32 %v196_v46, %v195_v53  ;;  %v209_v58 = vmax.f32 %v201_v51, %v203_v54  ;;  %v963_v46 = vld [vmem:[#allocation4 + $0x20] sm:$0xff]  ;;  %v960_v51 = vld [vmem:[#allocation4 + $0x8] sm:$0xff]  ;;  %v421_v53 = vperm.slane %v419_v50, 0 }
 0x134   :  { %522 = vmatpush.bf16.msrb.mxu0 %v963_v46 }
 0x135   :  { %v200_v56 = vpack.c.bf16 %v198_v55, %v198_v55  ;;  %v1187_v61 = vpack.c.bf16 %v209_v58, %v209_v58 }
 0x137   :  { %v202_v57 = vunpack.c.l.bf16 %v200_v56  ;;  %v231_v63 = vunpack.c.l.b16 %v1187_v61  ;;  %v311_v20 = vunpack.c.l.bf16 %v1187_v61  ;;  %v424_v56 = vunpack.c.l.bf16 %v421_v53  ;;  %v976_v61 = vld [vmem:[%s1276_s13 + $0x8] sm:$0xff] }
 0x138   :  { %523 = vmatpush.bf16.msrb.mxu0 %v962_v47 }
 0x139   :  { %v204_v59 = vmul.f32 0.010009766, %v202_v57 }
 0x13b   :  { %v210_v60 = vmax.f32 %v202_v57, %v204_v59 }
 0x13c   :  { %524 = vmatpush.bf16.msrb.mxu0 %v961_v49 }
 0x13d   :  { %v1189_v62 = vpack.c.bf16 %v210_v60, %v210_v60 }
 0x13f   :  { %v232_v0 = vunpack.c.l.b16 %v1189_v62  ;;  %v312_v29 = vunpack.c.l.bf16 %v1189_v62  ;;  %v975_v62 = vld [vmem:[%s1276_s13] sm:$0xff] }
 0x140   :  { %525 = vmatpush.bf16.msrb.mxu0 %v960_v51 }
 0x141   :  { %v233_v1 = vpack.c.b16 %v232_v0, %v231_v63 }
 0x143   :  { %291 = vmatmul.bf16.vlgmr.msra.gmra.mxu2 %v233_v1 }
 0x144   :  { %526 = vmatpush.bf16.msrb.mxu0 %v959_v52 }
 0x1c6   :  { %v292_v13 = vpop.f32.mrf.mxu2 }
 0x1c7   :  { %v297_v14 = vpack.c.bf16 %v292_v13, %v292_v13 }
 0x1c9   :  { %v304_v16 = vunpack.c.l.bf16 %v297_v14 }
 0x1cb   :  { %v307_v17 = vadd.f32 %v306_v15, %v304_v16 }
 0x1cd   :  { %v309_v18 = vpack.c.bf16 %v307_v17, %v307_v17 }
 0x1ce   :  { %v294_v19 = vpop.f32.mrf.mxu2 }
 0x1cf   :  { %v313_v21 = vunpack.c.l.bf16 %v309_v18  ;;  %v298_v22 = vpack.c.bf16 %v294_v19, %v294_v19 }
 0x1d1   :  { %v315_v23 = vadd.f32 %v313_v21, %v311_v20  ;;  %v305_v24 = vunpack.c.l.bf16 %v298_v22 }
 0x1d3   :  { %v317_v25 = vpack.c.bf16 %v315_v23, %v315_v23  ;;  %v308_v26 = vadd.f32 %v306_v15, %v305_v24  ;;  %v974_v23 = vld [vmem:[%s1274_s11 + $0x38] sm:$0xff]  ;;  %v973_v24 = vld [vmem:[%s1274_s11 + $0x30] sm:$0xff] }
 0x1d4   :  { %636 = vmatpush.bf16.msrb.mxu1 %v974_v23 }
 0x1d5   :  { %v319_v27 = vunpack.c.l.bf16 %v317_v25  ;;  %v310_v28 = vpack.c.bf16 %v308_v26, %v308_v26  ;;  %v972_v25 = vld [vmem:[%s1274_s11 + $0x28] sm:$0xff]  ;;  %v971_v26 = vld [vmem:[%s1274_s11 + $0x20] sm:$0xff] }
 0x1d7   :  { %v314_v30 = vunpack.c.l.bf16 %v310_v28  ;;  %v321_v32 = vmul.f32 0.010009766, %v319_v27  ;;  %v535_v28 = vld [vmem:[%s1273_s10] sm:$0x1] }
 0x1d8   :  { %637 = vmatpush.bf16.msrb.mxu1 %v973_v24 }
 0x1d9   :  { %v316_v31 = vadd.f32 %v314_v30, %v312_v29  ;;  %v327_v35 = vmax.f32 %v319_v27, %v321_v32  ;;  %v970_v27 = vld [vmem:[%s1274_s11 + $0x18] sm:$0xff]  ;;  %v969_v30 = vld [vmem:[%s1274_s11 + $0x10] sm:$0xff]  ;;  %v968_v32 = vld [vmem:[%s1274_s11 + $0x8] sm:$0xff] }
 0x1db   :  { %v318_v33 = vpack.c.bf16 %v316_v31, %v316_v31  ;;  %v329_v38 = vpack.c.bf16 %v327_v35, %v327_v35  ;;  %v537_v31 = vpack.i.b16 %v535_v28, %v535_v28 }
 0x1dc   :  { %638 = vmatpush.bf16.msrb.mxu1 %v972_v25 }
 0x1dd   :  { %v320_v34 = vunpack.c.l.bf16 %v318_v33  ;;  %v349_v40 = vunpack.c.l.b16 %v329_v38  ;;  %v429_v63 = vunpack.c.l.bf16 %v329_v38  ;;  %v539_v33 = vperm.slane %v537_v31, 0 }
 0x1df   :  { %v322_v36 = vmul.f32 0.010009766, %v320_v34 }
 0x1e0   :  { %639 = vmatpush.bf16.msrb.mxu1 %v971_v26 }
 0x1e1   :  { %v328_v37 = vmax.f32 %v320_v34, %v322_v36  ;;  %v967_v34 = vld [vmem:[%s1274_s11] sm:$0xff] }
 0x1e3   :  { %v330_v39 = vpack.c.bf16 %v328_v37, %v328_v37  ;;  %v542_v37 = vunpack.c.l.bf16 %v539_v33 }
 0x1e4   :  { %640 = vmatpush.bf16.msrb.mxu1 %v970_v27  ;;  %v683_v27 = vld [vmem:[%s1277_s14] sm:$0x1] }
 0x1e5   :  { %v350_v41 = vunpack.c.l.b16 %v330_v39  ;;  %v430_v8 = vunpack.c.l.bf16 %v330_v39  ;;  %v684_v28 = vunpack.c.l.bf16 %v683_v27 }
 0x1e7   :  { %v351_v42 = vpack.c.b16 %v350_v41, %v349_v40 }
 0x1e8   :  { %641 = vmatpush.bf16.msrb.mxu1 %v969_v30  ;;  %v685_v30 = vperm.slane %v684_v28, 0 }
 0x1e9   :  { %409 = vmatmul.bf16.vlgmr.msra.gmra.mxu3 %v351_v42 }
 0x1ec   :  { %642 = vmatpush.bf16.msrb.mxu1 %v968_v32 }
 0x1f0   :  { %643 = vmatpush.bf16.msrb.mxu1 %v967_v34 }
 0x26c   :  { %v410_v54 = vpop.f32.mrf.mxu3 }
 0x26d   :  { %v415_v55 = vpack.c.bf16 %v410_v54, %v410_v54 }
 0x26f   :  { %v422_v57 = vunpack.c.l.bf16 %v415_v55 }
 0x271   :  { %v425_v58 = vadd.f32 %v424_v56, %v422_v57 }
 0x273   :  { %v427_v59 = vpack.c.bf16 %v425_v58, %v425_v58 }
 0x274   :  { %v412_v60 = vpop.f32.mrf.mxu3 }
 0x275   :  { %v431_v0 = vunpack.c.l.bf16 %v427_v59  ;;  %v416_v1 = vpack.c.bf16 %v412_v60, %v412_v60 }
 0x277   :  { %v433_v2 = vadd.f32 %v431_v0, %v429_v63  ;;  %v423_v3 = vunpack.c.l.bf16 %v416_v1 }
 0x279   :  { %v435_v4 = vpack.c.bf16 %v433_v2, %v433_v2  ;;  %v426_v5 = vadd.f32 %v424_v56, %v423_v3 }
 0x27b   :  { %v437_v6 = vunpack.c.l.bf16 %v435_v4  ;;  %v428_v7 = vpack.c.bf16 %v426_v5, %v426_v5  ;;  %v978_v5 = vld [vmem:[%s1276_s13 + $0x18] sm:$0xff] }
 0x27c   :  { %717 = vmatpush.bf16.msrb.mxu2 %v978_v5 }
 0x27d   :  { %v432_v9 = vunpack.c.l.bf16 %v428_v7  ;;  %v439_v10 = vmul.f32 0.010009766, %v437_v6 }
 0x27f   :  { %v434_v11 = vadd.f32 %v432_v9, %v430_v8  ;;  %v445_v14 = vmax.f32 %v437_v6, %v439_v10  ;;  %v977_v6 = vld [vmem:[%s1276_s13 + $0x10] sm:$0xff] }
 0x280   :  { %718 = vmatpush.bf16.msrb.mxu2 %v977_v6 }
 0x281   :  { %v436_v12 = vpack.c.bf16 %v434_v11, %v434_v11  ;;  %v447_v17 = vpack.c.bf16 %v445_v14, %v445_v14 }
 0x283   :  { %v438_v13 = vunpack.c.l.bf16 %v436_v12  ;;  %v467_v19 = vunpack.c.l.b16 %v447_v17  ;;  %v547_v42 = vunpack.c.l.bf16 %v447_v17 }
 0x284   :  { %719 = vmatpush.bf16.msrb.mxu2 %v976_v61 }
 0x285   :  { %v440_v15 = vmul.f32 0.010009766, %v438_v13 }
 0x287   :  { %v446_v16 = vmax.f32 %v438_v13, %v440_v15 }
 0x288   :  { %720 = vmatpush.bf16.msrb.mxu2 %v975_v62 }
 0x289   :  { %v448_v18 = vpack.c.bf16 %v446_v16, %v446_v16 }
 0x28b   :  { %v468_v21 = vunpack.c.l.b16 %v448_v18  ;;  %v548_v52 = vunpack.c.l.bf16 %v448_v18 }
 0x28d   :  { %v469_v22 = vpack.c.b16 %v468_v21, %v467_v19 }
 0x28f   :  { %527 = vmatmul.bf16.vlgmr.msrb.gmra.mxu0 %v469_v22 }
 0x30c   :  { %v528_v35 = vpop.f32.mrf.mxu0 }
 0x30d   :  { %v533_v36 = vpack.c.bf16 %v528_v35, %v528_v35 }
 0x30f   :  { %v540_v38 = vunpack.c.l.bf16 %v533_v36 }
 0x311   :  { %v543_v39 = vadd.f32 %v542_v37, %v540_v38 }
 0x313   :  { %v545_v40 = vpack.c.bf16 %v543_v39, %v543_v39 }
 0x314   :  { %v530_v41 = vpop.f32.mrf.mxu0 }
 0x315   :  { %v549_v43 = vunpack.c.l.bf16 %v545_v40  ;;  %v534_v44 = vpack.c.bf16 %v530_v41, %v530_v41 }
 0x317   :  { %v551_v45 = vadd.f32 %v549_v43, %v547_v42  ;;  %v541_v46 = vunpack.c.l.bf16 %v534_v44 }
 0x319   :  { %v553_v47 = vpack.c.bf16 %v551_v45, %v551_v45  ;;  %v544_v48 = vadd.f32 %v542_v37, %v541_v46 }
 0x31b   :  { %v555_v49 = vunpack.c.l.bf16 %v553_v47  ;;  %v546_v50 = vpack.c.bf16 %v544_v48, %v544_v48 }
 0x31d   :  { %v557_v51 = vmul.f32 0.010009766, %v555_v49  ;;  %v550_v53 = vunpack.c.l.bf16 %v546_v50 }
 0x31f   :  { %v552_v54 = vadd.f32 %v550_v53, %v548_v52  ;;  %v563_v56 = vmax.f32 %v555_v49, %v557_v51 }
 0x321   :  { %v554_v55 = vpack.c.bf16 %v552_v54, %v552_v54  ;;  %v565_v59 = vpack.c.bf16 %v563_v56, %v563_v56 }
 0x323   :  { %v556_v57 = vunpack.c.l.bf16 %v554_v55  ;;  %v567_v0 = vunpack.c.l.bf16 %v565_v59 }
 0x325   :  { %v558_v58 = vmul.f32 0.010009766, %v556_v57  ;;  %v569_v2 = vadd.f32 %v567_v0, %v311_v20  ;;  %v652_v20 = vld [vmem:[%s1275_s12] sm:$0x1] }
 0x327   :  { %v564_v60 = vmax.f32 %v556_v57, %v558_v58 }
 0x329   :  { %v566_v63 = vpack.c.bf16 %v564_v60, %v564_v60 }
 0x32b   :  { %v568_v1 = vunpack.c.l.bf16 %v566_v63 }
 0x32d   :  { %v570_v3 = vadd.f32 %v568_v1, %v312_v29  ;;  %v654_v29 = vpack.i.b16 %v652_v20, %v652_v20 }
 0x32f   :  { %v571_v4 = vpack.c.bf16 %v570_v3, %v569_v2  ;;  %v656_v7 = vperm.slane %v654_v29, 0 }
 0x331   :  { %644 = vmatmul.bf16.vlgmr.msrb.gmra.mxu1 %v571_v4  ;;  %v659_v10 = vunpack.c.l.bf16 %v656_v7 }
 0x3ae   :  { %v645_v8 = vpop.f32.mrf.mxu1 }
 0x3af   :  { %v650_v9 = vpack.c.bf16 %v645_v8, %v645_v8 }
 0x3b1   :  { %v657_v11 = vunpack.c.l.bf16 %v650_v9 }
 0x3b3   :  { %v660_v12 = vadd.f32 %v659_v10, %v657_v11 }
 0x3b5   :  { %v662_v14 = vpack.c.bf16 %v660_v12, %v660_v12 }
 0x3b6   :  { %v647_v13 = vpop.f32.mrf.mxu1 }
 0x3b7   :  { %v651_v15 = vpack.c.bf16 %v647_v13, %v647_v13  ;;  %v664_v17 = vunpack.c.l.bf16 %v662_v14 }
 0x3b9   :  { %v658_v16 = vunpack.c.l.bf16 %v651_v15  ;;  %v666_v21 = vmul.f32 0.010009766, %v664_v17 }
 0x3bb   :  { %v661_v18 = vadd.f32 %v659_v10, %v658_v16  ;;  %v672_v24 = vmax.f32 %v664_v17, %v666_v21 }
 0x3bd   :  { %v663_v19 = vpack.c.bf16 %v661_v18, %v661_v18 }
 0x3bf   :  { %v665_v22 = vunpack.c.l.bf16 %v663_v19 }
 0x3c1   :  { %v667_v23 = vmul.f32 0.010009766, %v665_v22 }
 0x3c3   :  { %v673_v25 = vmax.f32 %v665_v22, %v667_v23 }
 0x3c5   :  { %v674_v26 = vpack.c.bf16 %v673_v25, %v672_v24 }
 0x3c7   :  { %936 = vmatmul.msk.bf16.vlgmr.msrb.gmra.mxu2 %vm169_vm3, %v674_v26 }
 0x44a   :  { %v722_v31 = vpop.f32.mrf.mxu2 }
 0x44b   :  { %v723_v32 = vadd.f32 %v722_v31, %v685_v30 }
 0x44d   :  { %v937_v33 = vmul.f32 -1.442695, %v723_v32 }
 0x44f   :  { %984 = vpow2.f32 %v937_v33 }
 0x452   :  { %v724_v34 = vpop.f32.mrf.mxu2 }
 0x453   :  { %v725_v35 = vadd.f32 %v724_v34, %v685_v30 }
 0x455   :  { %v985_v36 = vpop.eup %984  ;;  %v938_v37 = vmul.f32 -1.442695, %v725_v35 }
 0x456   :  { %v733_v38 = vadd.f32 1.0, %v985_v36 }
 0x457   :  { %986 = vpow2.f32 %v938_v37 }
 0x458   :  { %988 = vrcp.f32 %v733_v38  ;;  %v746_v44 = vand.u32 2147483648, %v733_v38  ;;  %v744_v46 = vand.u32 2147483647, %v733_v38  ;;  %vm740_vm5 = vweird.f32 %v733_v38 }
 0x45a   :  { %v747_v49 = vor.u32 1.1754944e-38, %v746_v44  ;;  %vm745_vm8 = vcmp.eq.f32.partialorder %v744_v46, 8.507059e+37 }
 0x45d   :  { %v987_v39 = vpop.eup %986 }
 0x45e   :  { %v989_v40 = vpop.eup %988  ;;  %v734_v41 = vadd.f32 1.0, %v987_v39 }
 0x45f   :  { %v736_v42 = vmul.f32 %v989_v40, %v733_v38  ;;  %vm741_vm4 = vweird.f32 %v989_v40 }
 0x460   :  { %990 = vrcp.f32 %v734_v41  ;;  %vm742_vm6 = vmor %vm740_vm5, %vm741_vm4  ;;  %v761_v54 = vand.u32 2147483648, %v734_v41  ;;  %v759_v56 = vand.u32 2147483647, %v734_v41  ;;  %vm755_vm10 = vweird.f32 %v734_v41 }
 0x461   :  { %v737_v43 = vsub.f32 1.0, %v736_v42 }
 0x462   :  { %v762_v58 = vor.u32 1.1754944e-38, %v761_v54  ;;  %vm760_vm12 = vcmp.eq.f32.partialorder %v759_v56, 8.507059e+37 }
 0x463   :  { %v738_v45 = vmul.f32 %v989_v40, %v737_v43 }
 0x465   :  { %v739_v47 = vadd.f32 %v989_v40, %v738_v45 }
 0x466   :  { %v991_v48 = vpop.eup %990 }
 0x467   :  { %v743_v50 = vsel %vm742_vm6, %v989_v40, %v739_v47  ;;  %v751_v51 = vmul.f32 %v991_v48, %v734_v41  ;;  %vm756_vm9 = vweird.f32 %v991_v48 }
 0x468   :  { %v748_v52 = vsel %vm745_vm8, %v747_v49, %v743_v50  ;;  %vm757_vm11 = vmor %vm755_vm10, %vm756_vm9 }
 0x469   :  { %766 = vst.msk [vmem:[%s1278_s15] sm:$0xff] %vm765_vm7, %v748_v52  ;;  %v752_v53 = vsub.f32 1.0, %v751_v51 }
 0x46b   :  { %v753_v55 = vmul.f32 %v991_v48, %v752_v53 }
 0x46d   :  { %v754_v57 = vadd.f32 %v991_v48, %v753_v55 }
 0x46f   :  { %v758_v59 = vsel %vm757_vm11, %v991_v48, %v754_v57 }
 0x470   :  { %v763_v60 = vsel %vm760_vm12, %v762_v58, %v758_v59 }
 0x471   :  { %767 = vst.msk [vmem:[%s1278_s15 + $0x8] sm:$0xff] %vm765_vm7, %v763_v60 }
 0x472   :  { %772 = vsyncpa [#allocation3], 1 }
 0x473   :  { %773 = vsyncpa [#allocation5], 1 }

</bundles_post_ra>
